<compile_context>
chip_gen: v7x
topology: tpu7x:2x2x1
jax: 0.10.0
libtpu: 0.0.40
codegen_flags: <defaults>
</compile_context>

<pallas_src>
import functools
import math
import numpy as np
import jax
import jax.numpy as jnp
from jax.experimental import pallas as pl
from jax.experimental.pallas import tpu as pltpu

Sub_Object = ['Back', 'person', 'bench', 'backpack', 'handbag', 'bottle',
              'wine glass', 'cup', 'bowl', 'chair', 'couch', 'bed',
              'dining table', 'tv', 'laptop', 'remote', 'cell phone',
              'refrigerator', 'book']


# ----------------------------------------------------------------------------
# Host-side glue (verbatim ports of the NumPy/Python helpers)
# ----------------------------------------------------------------------------
def compute_iou(rec1, rec2):
    S_rec1 = (rec1[2] - rec1[0]) * (rec1[3] - rec1[1])
    S_rec2 = (rec2[2] - rec2[0]) * (rec2[3] - rec2[1])
    sum_area = S_rec1 + S_rec2
    left_line = max(rec1[1], rec2[1])
    right_line = min(rec1[3], rec2[3])
    top_line = max(rec1[0], rec2[0])
    bottom_line = min(rec1[2], rec2[2])
    if left_line >= right_line or top_line >= bottom_line:
        return 0
    else:
        intersect = (right_line - left_line) * (bottom_line - top_line)
        return intersect / (sum_area - intersect)


def box_encode(h_bx, O_BOX, Im_H, Im_W):
    encode = []
    h_x1, h_y1, h_x2, h_y2, score, _ = h_bx
    h_cx, h_cy, h_w, h_h = ((h_x1 + h_x2) / 2, (h_y1 + h_y2) / 2,
                            h_x2 - h_x1, h_y2 - h_y1)
    for o_box in O_BOX:
        o_x1, o_y1, o_x2, o_y2, sor, cls = o_box
        o_cx, o_cy, o_w, o_h = ((o_x1 + o_x2) / 2, (o_y1 + o_y2) / 2,
                                o_x2 - o_x1, o_y2 - o_y1)
        d_x, d_y, d_xy = (abs(h_cx - o_cx) / h_w * 100,
                          abs(h_cy - o_cy) / h_h * 100,
                          math.sqrt((h_cx - o_cx) ** 2 + (h_cy - o_cy) ** 2)
                          / (h_w + h_h) * 100)
        dx_ratio, dy_ratio = (abs(h_cx - o_cx) / Im_W * 100,
                              abs(h_cy - o_cy) / Im_H * 100)
        if abs(h_cy - o_cy) > 1e-05:
            det_y = h_cy - o_cy
        elif h_cy - o_cy > 0:
            det_y = 1e-05
        else:
            det_y = -1e-05
        angle = math.atan((h_cx - o_cx) / det_y)
        o_h_area_scale = o_w * o_h / (h_w * h_h)
        o_scale = o_h / o_w
        IoU = compute_iou(h_bx[:4], o_box[:4])
        code = {'d_x': d_x, 'd_y': d_y, 'd_xy': d_xy, 'dx_ratio': dx_ratio,
                'dy_ratio': dy_ratio, 'angle': angle,
                'o_h_area_scale': o_h_area_scale, 'o_scale': o_scale,
                'IoU': IoU, 'Obj_class': int(cls),
                'Obj_name': Sub_Object[int(cls)], 'Obj_score': sor}
        encode.append(code)
    return encode


def H_O_BBOX(H_BOX, O_BOX, Im_H, Im_W):
    O_BOX = np.array(O_BOX)
    H_O_ROI = []
    geometry = []
    for h_bx in H_BOX:
        h_x1, h_y1, h_x2, h_y2, score, _ = h_bx
        O_x1, O_y1, O_x2, O_y2, Sor, cls = (O_BOX[:, 0], O_BOX[:, 1],
                                            O_BOX[:, 2], O_BOX[:, 3],
                                            O_BOX[:, 4], O_BOX[:, 5])
        H_O_x1 = np.minimum(O_x1, h_x1)
        H_O_y1 = np.minimum(O_y1, h_y1)
        H_O_x2 = np.maximum(O_x2, h_x2)
        H_O_y2 = np.maximum(O_y2, h_y2)
        for h_o_box in zip(H_O_x1, H_O_y1, H_O_x2, H_O_y2):
            H_O_ROI.append(list(h_o_box))
        encode = box_encode(h_bx, O_BOX.tolist(), Im_H, Im_W)
        geometry.append(encode)
    return (H_O_ROI, geometry)


def area_sacale_ratio(BBox, im_h, im_w):
    im_area = im_h * im_w
    out = []
    for bx in BBox:
        x1, y1, x2, y2, *_ = bx
        area_box = (x2 - x1) * (y2 - y1)
        ratio = area_box / im_area * 100
        out.append(ratio)
    return out


# ----------------------------------------------------------------------------
# RoIAlign average-pool bin weights (host: pure coordinate math, shape-static)
# ----------------------------------------------------------------------------
# TODO(synk): the original RoIAlignAvg is an external CUDA op whose exact
# sampling scheme is not in the source file; we use the standard bilinear
# RoIAlign (sampling_ratio=2) averaged per bin.
# TODO(synk): if nH*nO grows large enough that the W upload dominates,
# switch to the separable (wy ⊗ wx) two-matmul formulation (~49x fewer
# weight bytes); for a handful of boxes the dense form is fine.
def roi_align_weight_matrix(boxes_xyxy, H, W, P, spatial_scale,
                            sampling_ratio=2):
    """boxes_xyxy: (R, 4) in input-image coords. Returns (H*W, R*P*P) f32."""
    b = np.asarray(boxes_xyxy, dtype=np.float64)
    R = b.shape[0]
    ns = sampling_ratio
    x1 = b[:, 0] * spatial_scale
    y1 = b[:, 1] * spatial_scale
    x2 = b[:, 2] * spatial_scale
    y2 = b[:, 3] * spatial_scale
    roi_w = np.maximum(x2 - x1, 1.0)
    roi_h = np.maximum(y2 - y1, 1.0)
    bin_w = roi_w / P
    bin_h = roi_h / P
    frac = (np.arange(ns) + 0.5) / ns                       # (ns,)
    bins = np.arange(P)                                     # (P,)
    sx = x1[:, None, None] + (bins[None, :, None] + frac[None, None, :]) * bin_w[:, None, None]
    sy = y1[:, None, None] + (bins[None, :, None] + frac[None, None, :]) * bin_h[:, None, None]
    sx = np.clip(sx, 0.0, W - 1)                            # (R, P, ns)
    sy = np.clip(sy, 0.0, H - 1)
    wx = np.maximum(0.0, 1.0 - np.abs(sx[..., None] - np.arange(W)))  # (R,P,ns,W)
    wy = np.maximum(0.0, 1.0 - np.abs(sy[..., None] - np.arange(H)))  # (R,P,ns,H)
    wx_bin = wx.mean(axis=2)                                # (R, P, W)
    wy_bin = wy.mean(axis=2)                                # (R, P, H)
    Wm = np.einsum('rah,rbw->rabhw', wy_bin, wx_bin)        # (R, P, P, H, W)
    Wm = Wm.reshape(R * P * P, H * W).T                     # (H*W, R*P*P)
    return Wm.astype(np.float32)


def _round_up(n, m):
    return ((n + m - 1) // m) * m


def _next_pow2(n):
    return 1 << max(0, (int(n) - 1)).bit_length()


# ----------------------------------------------------------------------------
# Tiling selection (host, pure Python)
# ----------------------------------------------------------------------------
_VMEM_BUDGET = 12 << 20      # double-buffered per-step working set target


def _step_bytes(bn, C, hw, hwp, nbt):
    return (2 * (bn * C * hw * 4          # f32 feature block (double-buffered)
                 + bn * hwp * nbt * 2     # bf16 weight block
                 + bn * C * nbt * 2)      # bf16 output block
            + bn * C * hwp * 2)           # bf16 pad scratch (single)


def _choose_tiling(n_frames, C, hw, hwp, nb_pad):
    """Pick (Bn frames per step, NB column tile)."""
    nbt = nb_pad
    # NB column-tiling fallback: shrink the column tile until one frame fits
    # comfortably (guards v7x's 64 MiB physical VMEM / 32 MiB scoped default).
    while nbt > 512 and _step_bytes(1, C, hw, hwp, nbt) > _VMEM_BUDGET // 2:
        nbt //= 2
    # Frame batching: as many frames per step as the budget allows.
    bn = 16
    while bn > 1 and _step_bytes(bn, C, hw, hwp, nbt) > _VMEM_BUDGET:
        bn //= 2
    # Keep >=2 grid steps on the frame axis so both v7x TCs get work.
    while bn > 1 and -(-n_frames // bn) < 2:
        bn //= 2
    return max(bn, 1), nbt


# ----------------------------------------------------------------------------
# Pallas kernel: for a block of Bn frames and one NB column tile,
#   pooled[b] = feat[b] @ W[b]        (MXU, f32 accumulation, bf16 store)
# Features arrive as raw f32 (C, HW); the bf16 cast and the HW -> HW_PAD
# zero-padding happen here (VPU/VMEM, essentially free).
# ----------------------------------------------------------------------------
def _roi_pool_kernel(f_ref, w_ref, o_ref, fpad_ref, *, hw):
    bn, c, hwp = fpad_ref.shape
    if hwp > hw:
        # Zero every step (safe under megacore "parallel" grid sharding),
        # then overwrite the live region with the bf16-cast features.
        fpad_ref[...] = jnp.zeros((bn, c, hwp), dtype=jnp.bfloat16)
        fpad_ref[:, :, :hw] = f_ref[...].astype(jnp.bfloat16)
    else:
        fpad_ref[...] = f_ref[...].astype(jnp.bfloat16)
    # Unrolled per-frame 2D matmuls (Bn independent MXU calls).
    for b in range(bn):
        acc = jnp.dot(fpad_ref[b], w_ref[b],
                      preferred_element_type=jnp.float32)
        o_ref[b] = acc.astype(o_ref.dtype)


def roi_pool_batched(feat_f32, w_bf16, *, bn, nbt):
    """feat_f32: (N, C, HW) f32;  w_bf16: (N, HWp, NBp) bf16 -> (N, C, NBp) bf16."""
    n, c, hw = feat_f32.shape
    n2, hwp, nbp = w_bf16.shape
    assert n == n2 and n % bn == 0 and nbp % nbt == 0
    grid = (n // bn, nbp // nbt)

    sb = _step_bytes(bn, c, hw, hwp, nbt)
    vmem_limit = int(min(max(sb * 3 // 2 + (2 << 20), 16 << 20), 48 << 20))

    kernel = functools.partial(_roi_pool_kernel, hw=hw)
    return pl.pallas_call(
        kernel,
        out_shape=jax.ShapeDtypeStruct((n, c, nbp), jnp.bfloat16),
        grid=grid,
        in_specs=[pl.BlockSpec((bn, c, hw), lambda i, j: (i, 0, 0)),
                  pl.BlockSpec((bn, hwp, nbt), lambda i, j: (i, 0, j))],
        out_specs=pl.BlockSpec((bn, c, nbt), lambda i, j: (i, 0, j)),
        scratch_shapes=[pltpu.VMEM((bn, c, hwp), jnp.bfloat16)],
        compiler_params=pltpu.CompilerParams(
            dimension_semantics=("parallel", "parallel"),
            vmem_limit_bytes=vmem_limit),
    )(feat_f32, w_bf16)


@functools.partial(jax.jit, static_argnames=("bn", "nbt", "use_identity"))
def _device_forward(x, flat_idx, w_bf16, *, bn, nbt, use_identity):
    """x: (V, F, C, Hf, Wf) f32; w_bf16: (Npad, HWp, NBp) bf16.

    One jitted graph: (free) frame reshape, one batched pallas_call, plus the
    S_node column and the center-crop Fake_H_S.  No gathered/padded/cast copy
    of the feature tensor is materialized in HBM.
    """
    V, F, C, Hf, Wf = x.shape
    HW = Hf * Wf
    Npad = w_bf16.shape[0]
    feat = x.reshape(V * F, C, HW)                    # free (contiguous) reshape
    if use_identity:
        feat_sel = feat                               # Npad == V*F guaranteed
    else:
        feat_sel = feat[flat_idx]                     # gather fallback only
    pooled = roi_pool_batched(feat_sel, w_bf16, bn=bn, nbt=nbt)   # (Npad,C,NBp) bf16
    s_nodes = pooled[:, :, 0].astype(jnp.float32)                  # (Npad, C)
    fake = feat_sel.reshape(Npad, C, Hf, Wf)[:, :, 1:13, 1:13]     # (Npad,C,12,12) f32
    return pooled, s_nodes, fake


# ----------------------------------------------------------------------------
# RoI_layer_mulity (JAX / Pallas version)
# ----------------------------------------------------------------------------
class RoI_layer_mulity_pallas:
    def __init__(self, out_size, in_im_sz):
        self.out_size = out_size
        self.in_img_sz = in_im_sz
        self.spatial_scale = 1.0 / 16.0

    def forward(self, input, BBox_info=None):
        # input: (num_videos, num_frames, C, Hf, Wf) float32, NCHW per frame
        P = self.out_size
        x = jnp.asarray(input, dtype=jnp.float32)
        V, F, C, Hf, Wf = x.shape
        HW = Hf * Wf
        HW_PAD = _round_up(HW, 128)          # clean (8,128) contraction layout

        # -------- phase 1: host-side bookkeeping + per-frame weight columns
        frames_meta = []
        weight_mats = []
        vd_headers = []
        for vd_No, box_info in enumerate(BBox_info):
            im_h, im_w, vid, fn_No = (box_info[1], box_info[2],
                                      box_info[3], box_info[4])
            vd_headers.append([im_h, im_w, vid, fn_No])
            ratio_H = np.round(self.in_img_sz / im_h, 3)
            ratio_W = np.round(self.in_img_sz / im_w, 3)
            scale_vec = np.array([ratio_W, ratio_H, ratio_W, ratio_H])
            for bc_No, Box_fm in enumerate(box_info[0]):
                H_Box, O_Box, h_num, o_num, fn_No_f = Box_fm
                out_key = [True, h_num > 0, o_num > 0,
                           (h_num > 0 and o_num > 0)]
                out_num = [1, h_num, o_num, h_num * o_num]
                Score = [[0], [], [], []]
                H_area, O_area, HO_area = [], [], []
                Object_cls, geometry = [], []

                # weight columns: [global mean | H rois | O rois | HO rois]
                cols = [np.full((HW, 1), 1.0 / HW, np.float32)]
                nH = nO = nHO = 0
                if out_key[1]:
                    Score[1] = np.array(H_Box)[:, -2]
                    H_area = area_sacale_ratio(H_Box, im_h, im_w)
                    Hn_box = np.round(np.array(H_Box)[:, :4] * scale_vec, 3)
                    cols.append(roi_align_weight_matrix(
                        Hn_box, Hf, Wf, P, self.spatial_scale))
                    nH = Hn_box.shape[0]
                if out_key[2]:
                    Score[2] = np.array(O_Box)[:, -2]
                    O_area = area_sacale_ratio(O_Box, im_h, im_w)
                    On_box = np.round(np.array(O_Box)[:, :4] * scale_vec, 3)
                    cols.append(roi_align_weight_matrix(
                        On_box, Hf, Wf, P, self.spatial_scale))
                    nO = On_box.shape[0]
                    Object_cls.append(np.array(O_Box)[:, -1])
                    if out_key[3]:
                        H_O_ROI, geometry = H_O_BBOX(H_BOX=H_Box, O_BOX=O_Box,
                                                     Im_H=im_h, Im_W=im_w)
                        HO_area = area_sacale_ratio(H_O_ROI, im_h, im_w)
                        Score[3] = np.array(O_Box)[:, -2]
                        HOn_box = np.round(
                            np.array(H_O_ROI)[:, :4] * scale_vec, 3)
                        cols.append(roi_align_weight_matrix(
                            HOn_box, Hf, Wf, P, self.spatial_scale))
                        nHO = HOn_box.shape[0]

                weight_mats.append(np.concatenate(cols, axis=1))
                frames_meta.append(dict(
                    vd_No=vd_No, bc_No=bc_No, nH=nH, nO=nO, nHO=nHO,
                    out_key=out_key, out_num=out_num, Score=Score,
                    geometry=geometry,
                    area_ratio_fm=[H_area, O_area, HO_area, fn_No_f,
                                   Object_cls]))

        N_real = len(frames_meta)
        NB_max = max(w.shape[1] for w in weight_mats)
        # Bucket NB to a power-of-two (>=512): extra padded columns are nearly
        # free in a memory-bound matmul, compile-cache hits are not.
        NB_PAD = max(512, _next_pow2(NB_max))

        # -------- phase 2: pick tiles, one bf16 W upload, one pallas_call
        bn, nbt = _choose_tiling(N_real, C, HW, HW_PAD, NB_PAD)

        flat = np.array([m['vd_No'] * F + m['bc_No'] for m in frames_meta],
                        dtype=np.int32)
        identity = (N_real == V * F and
                    np.array_equal(flat, np.arange(V * F, dtype=np.int32)))
        if identity:
            while V * F % bn != 0:           # keep the zero-copy reshape path
                bn //= 2
            bn = max(bn, 1)
            N_pad = V * F
        else:
            N_pad = _round_up(N_real, bn)

        W_stack = np.zeros((N_pad, HW_PAD, NB_PAD), dtype=np.float32)
        for i, w in enumerate(weight_mats):
            W_stack[i, :HW, :w.shape[1]] = w
        W_dev = jnp.asarray(W_stack.astype(jnp.bfloat16))    # half the bytes

        flat_idx = np.zeros((N_pad,), dtype=np.int32)
        flat_idx[:N_real] = flat
        pooled, s_nodes, fake_crops = _device_forward(
            x, jnp.asarray(flat_idx), W_dev,
            bn=bn, nbt=nbt, use_identity=identity)

        # -------- phase 3: assemble outputs (async slices, no per-frame syncs)
        batch_out = []
        fidx = 0
        for vd_No, box_info in enumerate(BBox_info):
            vd_out = [vd_headers[vd_No]]
            for bc_No, _ in enumerate(box_info[0]):
                m = frames_meta[fidx]
                pooled_f = pooled[fidx]                     # (C, NB_PAD) bf16
                S_node = s_nodes[fidx:fidx + 1]             # (1, C) f32
                Fake_H_S = fake_crops[fidx:fidx + 1]        # (1, C, 12, 12) f32
                off = 1

                def take(n):
                    nonlocal off
                    if n == 0:
                        return None
                    blk = pooled_f[:, off:off + n * P * P].astype(jnp.float32)
                    off += n * P * P
                    return jnp.transpose(blk.reshape(C, n, P, P),
                                         (1, 0, 2, 3))      # (n, C, P, P)

                H_Node = take(m['nH']) if m['out_key'][1] else None
                O_Node = take(m['nO']) if m['out_key'][2] else None
                H_O_Node = (take(m['nHO'])
                            if (m['out_key'][2] and m['out_key'][3]) else None)

                vd_out.append([S_node, H_Node, O_Node, H_O_Node,
                               m['out_key'], m['out_num'], m['Score'],
                               m['geometry'], m['area_ratio_fm'], Fake_H_S])
                fidx += 1
            batch_out.append(vd_out)
        return batch_out


# ----------------------------------------------------------------------------
if __name__ == "__main__":
    key = jax.random.PRNGKey(0)
    V, F, C, in_im_sz = 2, 2, 8, 224
    Hf = Wf = in_im_sz // 16                                   # 14x14 feature map
    x = jax.random.normal(key, (V, F, C, Hf, Wf), dtype=jnp.float32)

    im_h, im_w = 180.0, 240.0
    BBox_info = []
    for v in range(V):
        frames = []
        for f in range(F):
            H_Box = [[20.0 + 5 * v, 30.0 + 5 * f, 150.0, 160.0, 0.9, 1]]
            O_Box = [[60.0, 40.0, 120.0, 110.0, 0.8, 7],
                     [10.0 + 3 * f, 90.0, 200.0, 170.0, 0.7, 13]]
            frames.append((H_Box, O_Box, len(H_Box), len(O_Box), f))
        BBox_info.append([frames, im_h, im_w, "vid%d" % v, 0])

    layer = RoI_layer_mulity_pallas(out_size=7, in_im_sz=in_im_sz)
    out = layer.forward(x, BBox_info)

    # block on all device results (single sync point after all dispatches)
    for vd_out in out:
        for item in vd_out[1:]:
            for t in (item[0], item[1], item[2], item[3], item[9]):
                if t is not None:
                    jax.block_until_ready(t)

    # sanity: S_node must equal the plain spatial mean of frame 0 of video 0
    # (bf16 operands / bf16 output -> relaxed tolerance; accumulation is f32)
    ref_S = np.asarray(x[0, 0]).mean(axis=(1, 2))
    got_S = np.asarray(out[0][1][0])[0]
    assert np.allclose(ref_S, got_S, atol=1e-2), (ref_S, got_S)

    # sanity: node shapes match the PyTorch module's RoIAlign outputs
    assert np.asarray(out[0][1][1]).shape == (1, C, 7, 7)      # H_Node
    assert np.asarray(out[0][1][2]).shape == (2, C, 7, 7)      # O_Node
    assert np.asarray(out[0][1][3]).shape == (2, C, 7, 7)      # H_O_Node
    assert np.asarray(out[0][1][9]).shape == (1, C, 12, 12)    # Fake_H_S

    print("KERNEL_OK")
</pallas_src>

<mosaic_0001>
module attributes {stable_mosaic.version = 11 : i64} {
  func.func @_roi_pool_kernel(%arg0: i32, %arg1: i32, %arg2: memref<2x8x196xf32, #tpu.memory_space<vmem>>, %arg3: memref<2x256x512xbf16, #tpu.memory_space<vmem>>, %arg4: memref<2x8x512xbf16, #tpu.memory_space<vmem>>, %arg5: memref<2x8x256xbf16, #tpu.memory_space<vmem>>) attributes {dimension_semantics = [#tpu.dimension_semantics<parallel>, #tpu.dimension_semantics<parallel>], iteration_bounds = array<i64: 2, 1>, scalar_prefetch = 0 : i64, scratch_operands = 1 : i64, tpu.core_type = #tpu.core_type<tc>, window_params = [{transform_indices = @transform_0, window_bounds = array<i64: 2, 8, 196>}, {transform_indices = @transform_1, window_bounds = array<i64: 2, 256, 512>}, {transform_indices = @transform_2, window_bounds = array<i64: 2, 8, 512>}]} {
    %cst = arith.constant 0.000000e+00 : bf16
    %0 = vector.broadcast %cst : bf16 to vector<2x8x256xbf16>
    %c0 = arith.constant 0 : index
    %c0_0 = arith.constant 0 : index
    %c0_1 = arith.constant 0 : index
    %1 = vector.load %arg5[%c0, %c0_0, %c0_1] : memref<2x8x256xbf16, #tpu.memory_space<vmem>>, vector<2x8x256xbf16>
    tpu.vector_store %arg5[%c0, %c0_0, %c0_1], %0 {strides = array<i32>} : memref<2x8x256xbf16, #tpu.memory_space<vmem>>, vector<2x8x256xbf16>,
    %c0_2 = arith.constant 0 : index
    %c0_3 = arith.constant 0 : index
    %c0_4 = arith.constant 0 : index
    %2 = vector.load %arg2[%c0_2, %c0_3, %c0_4] : memref<2x8x196xf32, #tpu.memory_space<vmem>>, vector<2x8x196xf32>
    %3 = arith.truncf %2 : vector<2x8x196xf32> to vector<2x8x196xbf16>
    %c0_5 = arith.constant 0 : index
    %c0_6 = arith.constant 0 : index
    %c0_7 = arith.constant 0 : index
    %4 = vector.load %arg5[%c0_5, %c0_6, %c0_7] : memref<2x8x256xbf16, #tpu.memory_space<vmem>>, vector<2x8x196xbf16>
    tpu.vector_store %arg5[%c0_5, %c0_6, %c0_7], %3 {strides = array<i32>} : memref<2x8x256xbf16, #tpu.memory_space<vmem>>, vector<2x8x196xbf16>,
    %c0_8 = arith.constant 0 : index
    %c0_9 = arith.constant 0 : index
    %c0_10 = arith.constant 0 : index
    %5 = vector.load %arg5[%c0_8, %c0_9, %c0_10] : memref<2x8x256xbf16, #tpu.memory_space<vmem>>, vector<1x8x256xbf16>
    %6 = vector.shape_cast %5 : vector<1x8x256xbf16> to vector<8x256xbf16>
    %c0_11 = arith.constant 0 : index
    %c0_12 = arith.constant 0 : index
    %c0_13 = arith.constant 0 : index
    %7 = vector.load %arg3[%c0_11, %c0_12, %c0_13] : memref<2x256x512xbf16, #tpu.memory_space<vmem>>, vector<1x256x512xbf16>
    %8 = vector.shape_cast %7 : vector<1x256x512xbf16> to vector<256x512xbf16>
    %cst_14 = arith.constant dense<0.000000e+00> : vector<8x512xf32>
    %9 = tpu.matmul %6, %8, %cst_14 {dimension_numbers = #tpu.dot_dimension_numbers<[1], [0], [0], [1], [0, 0, 1, 1], [], []>} : vector<8x256xbf16>, vector<256x512xbf16>, vector<8x512xf32> -> vector<8x512xf32>
    %10 = arith.truncf %9 : vector<8x512xf32> to vector<8x512xbf16>
    %c0_15 = arith.constant 0 : index
    %c0_16 = arith.constant 0 : index
    %c0_17 = arith.constant 0 : index
    %11 = vector.load %arg4[%c0_15, %c0_16, %c0_17] : memref<2x8x512xbf16, #tpu.memory_space<vmem>>, vector<1x8x512xbf16>
    %12 = vector.shape_cast %11 : vector<1x8x512xbf16> to vector<8x512xbf16>
    %13 = vector.shape_cast %10 : vector<8x512xbf16> to vector<1x8x512xbf16>
    tpu.vector_store %arg4[%c0_15, %c0_16, %c0_17], %13 {strides = array<i32>} : memref<2x8x512xbf16, #tpu.memory_space<vmem>>, vector<1x8x512xbf16>,
    %c1 = arith.constant 1 : index
    %c0_18 = arith.constant 0 : index
    %c0_19 = arith.constant 0 : index
    %14 = vector.load %arg5[%c1, %c0_18, %c0_19] : memref<2x8x256xbf16, #tpu.memory_space<vmem>>, vector<1x8x256xbf16>
    %15 = vector.shape_cast %14 : vector<1x8x256xbf16> to vector<8x256xbf16>
    %c1_20 = arith.constant 1 : index
    %c0_21 = arith.constant 0 : index
    %c0_22 = arith.constant 0 : index
    %16 = vector.load %arg3[%c1_20, %c0_21, %c0_22] : memref<2x256x512xbf16, #tpu.memory_space<vmem>>, vector<1x256x512xbf16>
    %17 = vector.shape_cast %16 : vector<1x256x512xbf16> to vector<256x512xbf16>
    %cst_23 = arith.constant dense<0.000000e+00> : vector<8x512xf32>
    %18 = tpu.matmul %15, %17, %cst_23 {dimension_numbers = #tpu.dot_dimension_numbers<[1], [0], [0], [1], [0, 0, 1, 1], [], []>} : vector<8x256xbf16>, vector<256x512xbf16>, vector<8x512xf32> -> vector<8x512xf32>
    %19 = arith.truncf %18 : vector<8x512xf32> to vector<8x512xbf16>
    %c1_24 = arith.constant 1 : index
    %c0_25 = arith.constant 0 : index
    %c0_26 = arith.constant 0 : index
    %20 = vector.load %arg4[%c1_24, %c0_25, %c0_26] : memref<2x8x512xbf16, #tpu.memory_space<vmem>>, vector<1x8x512xbf16>
    %21 = vector.shape_cast %20 : vector<1x8x512xbf16> to vector<8x512xbf16>
    %22 = vector.shape_cast %19 : vector<8x512xbf16> to vector<1x8x512xbf16>
    tpu.vector_store %arg4[%c1_24, %c0_25, %c0_26], %22 {strides = array<i32>} : memref<2x8x512xbf16, #tpu.memory_space<vmem>>, vector<1x8x512xbf16>,
    return
  }
  func.func @transform_0(%arg0: i32, %arg1: i32) -> (i32, i32, i32) {
    %c0_i32 = arith.constant 0 : i32
    %c0_i32_0 = arith.constant 0 : i32
    %c0_i32_1 = arith.constant 0 : i32
    return %arg0, %c0_i32, %c0_i32_0 : i32, i32, i32
  }
  func.func @transform_1(%arg0: i32, %arg1: i32) -> (i32, i32, i32) {
    %c0_i32 = arith.constant 0 : i32
    %c0_i32_0 = arith.constant 0 : i32
    return %arg0, %c0_i32, %arg1 : i32, i32, i32
  }
  func.func @transform_2(%arg0: i32, %arg1: i32) -> (i32, i32, i32) {
    %c0_i32 = arith.constant 0 : i32
    %c0_i32_0 = arith.constant 0 : i32
    return %arg0, %c0_i32, %arg1 : i32, i32, i32
  }
}

</mosaic_0001>

<bundles_post_ra>
// kernel: _device_forward.1
= control target key start
LH: loop header
LB: loop body
LE: loop exit
PB: predicated region body
PF: predicated region fallthrough
CT: control target
= control target key end

     0   :  { %7 = vsyncpa [#allocation4], 0  ;;  %s2211_s0 = inlined_call_operand.vmem [shape: f32[4,8,196], index: 0, kind: input, shape index: {}]   ;;  %s2212_s1 = inlined_call_operand.hbm [shape: bf16[4,256,512], index: 1, kind: input, shape index: {}]   ;;  %s2213_s2 = inlined_call_operand.vmem [shape: bf16[4,8,512], index: 2, kind: output, shape index: {}]  }
   0x1   :  { %9 = vsyncpa [#allocation4 + $0x1], 0  ;;  %s1934_s9 = smov 0   ;;  %s1936_s10 = smov 0  }
   0x2   :  { %s1938_s11 = smov 0   ;;  %s1940_s12 = smov 0  }
   0x3   :  { %s1942_s13 = smov 0   ;;  %s1944_s14 = smov 0  }
   0x4 LB: > { %s1347_s15 = sadd.s32 4294967295, %s1913_s14   ;;  %s27_s16 = sadd.s32 1, %s1909_s13  ;;  %s1913_s14 = sphi %s1944_s14, %s15_s14   ;;  %s1909_s13 = sphi %s1942_s13, %s2223_s13   ;;  %s1905_s12 = sphi %s1940_s12, %s2222_s12   ;;  %s1901_s11 = sphi %s1938_s11, %s2221_s11   ;;  %s1897_s10 = sphi %s1936_s10, %s2220_s10   ;;  %s1893_s9 = sphi %s1934_s9, %s2219_s9  }
   0x5   : > { %p29_p0 = scmp.ge.s32.totalorder %s27_s16, 2  ;;  %s62_s17 = sadd.s32 1, %s1901_s11 }
   0x6   : > { %p69_p1 = scmp.ne.s32.totalorder %s1901_s11, %s1897_s10  ;;  %p70_p2 = scmp.eq.s32.totalorder %s1913_s14, 0 }
   0x7   : > { %s2225_s16 = smov (%p29_p0, %s27_s16), 0  ;;  %p75_p4 = scmp.ne.s32.totalorder %s1897_s10, %s1893_s9 }
   0x8   : > { %p1970_p3 = por %p70_p2, %p69_p1  ;;  %s57_s19 = ssub.s32 %s1909_s13, %s2225_s16 }
   0x9   : > { %p76_p5 = scmp.eq.s32.totalorder %s1347_s15, 0  ;;  %p60_p6 = scmp.eq.s32.totalorder %s57_s19, 0 }
   0xa   : > { %p1585_p8 = scmp.lt.s32.totalorder %s1913_s14, 2  ;;  %s137_s22 = sand.u32 1, %s1901_s11  }
   0xb   : > { %p1977_p7 = por %p76_p5, %p75_p4  ;;  %s1570_s23 = sshll.u32 %s1909_s13, 14 }
   0xc   : > { %s1983_s21 = scalar_select %p60_p6, %s1901_s11, %s62_s17  }
   0xd   : > { %s1351_s24 = sshll.u32 %s137_s22, 10  ;;  %s1990_s27 = scalar_lea.hbm %s2212_s1, %s1570_s23 }
   0xe   : > { %s141_s28 = scalar_lea.vmem [#allocation3], %s1351_s24  ;;  %p1994_p9 = pnand %p1585_p8, %p1970_p3 }
   0xf   : > { %s151_s29 = sshll.u32 %s141_s28, 4  ;;  %s2000_s3 = scalar_lea.sflag [#allocation4], %s137_s22  ;;  %s1998_s29 = int_to_ptr.vmem [resolvable:$true] %s151_s29 }
  0x10   : > { %s1833_s4 = scalar_lea.hbm %s1990_s27, 16384  ;;  %p1835_p11 = pneg %p1994_p9 }
  0x11   : > { %p1834_p10 = scmp.ne.s32.totalorder %s1990_s27, %s1833_s4  ;;  %s1838_s7 = scalar_lea.hbm %s2212_s1, 32768 }
  0x12   : > { %p1839_p0 = scmp.lt.u32.totalorder %s1990_s27, %s2212_s1  ;;  %p1840_p1 = scmp.lt.u32.totalorder %s1838_s7, %s1833_s4 }
  0x13   : > { %p1836_p12 = pnand %p1835_p11, %p1834_p10  ;;  %p1842_p3 = scmp.lt.u32.totalorder %s1833_s4, %s1990_s27 }
  0x14   : > { %p1841_p2 = por %p1840_p1, %p1839_p0 }
  0x15   : > { %p1837_p13 = pneg %p1836_p12 }
  0x16   : > { %p1843_p4 = por %p1842_p3, %p1841_p2 }
  0x18   : > { %p1844_p5 = pnand %p1843_p4, %p1837_p13 }
  0x1a   : > { %1847 = shalt.err (!%p1844_p5)
}
  0x1b   : > { %s1848_s15 = scalar_lea.vmem %s1998_s29, 16384  ;;  %s1915_s17 = smov [#allocation3]  }
  0x1c   : > { %p1849_p6 = scmp.ne.s32.totalorder %s1998_s29, %s1848_s15  ;;  %s1853_s18 = sshll.u32 %s1915_s17, 4  ;;  %s1854_s18 = int_to_ptr.vmem [resolvable:$false] %s1853_s18 }
  0x1d   : > { %s1855_s19 = scalar_lea.vmem %s1854_s18, 32768  ;;  %p1856_p12 = scmp.lt.s32.totalorder %s1998_s29, %s1854_s18 }
  0x1e   : > { %p1851_p8 = pnand %p1849_p6, %p1835_p11  ;;  %p1857_p0 = scmp.lt.s32.totalorder %s1855_s19, %s1848_s15 }
  0x20   : > { %p1852_p10 = pneg %p1851_p8  ;;  %p1858_p1 = por %p1857_p0, %p1856_p12 }
  0x22   : > { %p1859_p2 = pnand %p1858_p1, %p1852_p10 }
  0x24   : > { %1862 = shalt.err (!%p1859_p2)
}
  0x25   : > { %s1916_s22 = smov 256   ;;  %s1917_s23 = smov 16  }
  0x26   : > { %1584 = dma.hbm_to_vmem [thread:$0]  (!%p1994_p9), %s1990_s27, 16384, %s1998_s29, %s2000_s3, %s1916_s22, %s1916_s22, %s1917_s23  }
  0x27   : > { %p1355_p11 = scmp.ge.s32.totalorder %s1913_s14, 1  ;;  %p159_p13 = scmp.lt.s32.totalorder %s1913_s14, 3 }
  0x29   : > { %p160_p3 = pnand %p1355_p11, %p159_p13 }
  0x2a   : > { %s165_s24 = sand.u32 (!%p160_p3), 1, %s1897_s10  }
  0x2b   : > { %163 = sbr.rel (%p160_p3) target bundleno = 396 (0x18c), region = 28  ;;  %s1356_s25 = sshll.u32 (!%p160_p3), %s165_s24, 10 }
  0x2c   : > { %s166_s26 = scalar_lea.sflag (!%p160_p3), [#allocation4], %s165_s24  ;;  %s2031_s28 = scalar_lea.vmem (!%p160_p3), [#allocation3], %s1356_s25 }
  0x32   : > { %1888 = dma.done.wait (%p1977_p7), %s166_s26, 16384  }
  0x33   : > { %1890 = vsyncadd (%p1977_p7), %s166_s26, 4294950912  ;;  %v1918_v0 = vmov 0   ;;  %v1637_v1 = vld [vmem:[%s2031_s28 + $0x4] ss:$16 sps:$4 sm:$0xff]   ;;  %v1639_v2 = vld [vmem:[%s2031_s28 + $0xc] ss:$16 sps:$4 sm:$0xff]  }
  0x34   : > { %223 = vst [vmem:[#allocation2] sm:$0xff] %v1918_v0  ;;  %224 = vst [vmem:[#allocation2 + $0x8] sm:$0xff] %v1918_v0  ;;  %642 = vmatprep.subr.bf16.mxu0 %v1637_v1  ;;  %v1641_v3 = vld [vmem:[%s2031_s28] ss:$16 sps:$4 sm:$0xff]   ;;  %v1642_v4 = vld [vmem:[%s2031_s28 + $0x8] ss:$16 sps:$4 sm:$0xff]   ;;  %683 = vmatprep.subr.bf16.mxu1 %v1639_v2 }
  0x35   : > { %v1643_v5 = vld [vmem:[%s2031_s28 + $0x24] ss:$16 sps:$4 sm:$0xff]   ;;  %643 = vmatpush1.bf16.msra.mxu0 %v1641_v3  ;;  %684 = vmatpush1.bf16.msra.mxu1 %v1642_v4  ;;  %v1645_v6 = vld [vmem:[%s2031_s28 + $0x2c] ss:$16 sps:$4 sm:$0xff]   ;;  %v1647_v7 = vld [vmem:[%s2031_s28 + $0x20] ss:$16 sps:$4 sm:$0xff]  }
  0x36   : > { %644 = vmatprep.subr.bf16.mxu0 %v1643_v5  ;;  %v1648_v8 = vld [vmem:[%s2031_s28 + $0x28] ss:$16 sps:$4 sm:$0xff]   ;;  %685 = vmatprep.subr.bf16.mxu1 %v1645_v6  ;;  %v1649_v9 = vld [vmem:[%s2031_s28 + $0x44] ss:$16 sps:$4 sm:$0xff]   ;;  %v1651_v10 = vld [vmem:[%s2031_s28 + $0x4c] ss:$16 sps:$4 sm:$0xff]  }
  0x37   : > { %v1653_v11 = vld [vmem:[%s2031_s28 + $0x40] ss:$16 sps:$4 sm:$0xff]   ;;  %v1654_v12 = vld [vmem:[%s2031_s28 + $0x48] ss:$16 sps:$4 sm:$0xff]   ;;  %v1655_v13 = vld [vmem:[%s2031_s28 + $0x64] ss:$16 sps:$4 sm:$0xff]  }
  0x38   : > { %v1657_v14 = vld [vmem:[%s2031_s28 + $0x6c] ss:$16 sps:$4 sm:$0xff]   ;;  %v1659_v15 = vld [vmem:[%s2031_s28 + $0x60] ss:$16 sps:$4 sm:$0xff]   ;;  %v1660_v16 = vld [vmem:[%s2031_s28 + $0x68] ss:$16 sps:$4 sm:$0xff]  }
  0x39   : > { %645 = vmatpush1.bf16.msra.mxu0 %v1647_v7  ;;  %686 = vmatpush1.bf16.msra.mxu1 %v1648_v8  ;;  %v1661_v17 = vld [vmem:[%s2031_s28 + $0x84] ss:$16 sps:$4 sm:$0xff]   ;;  %v1663_v18 = vld [vmem:[%s2031_s28 + $0x8c] ss:$16 sps:$4 sm:$0xff]   ;;  %v1665_v19 = vld [vmem:[%s2031_s28 + $0x80] ss:$16 sps:$4 sm:$0xff]  }
  0x3a   : > { %646 = vmatprep.subr.bf16.mxu0 %v1649_v9  ;;  %687 = vmatprep.subr.bf16.mxu1 %v1651_v10  ;;  %v1666_v20 = vld [vmem:[%s2031_s28 + $0x88] ss:$16 sps:$4 sm:$0xff]   ;;  %v1667_v21 = vld [vmem:[%s2031_s28 + $0xa4] ss:$16 sps:$4 sm:$0xff]   ;;  %v1669_v22 = vld [vmem:[%s2031_s28 + $0xac] ss:$16 sps:$4 sm:$0xff]  }
  0x3b   : > { %v1671_v23 = vld [vmem:[%s2031_s28 + $0xa0] ss:$16 sps:$4 sm:$0xff]   ;;  %v1672_v24 = vld [vmem:[%s2031_s28 + $0xa8] ss:$16 sps:$4 sm:$0xff]   ;;  %v1673_v25 = vld [vmem:[%s2031_s28 + $0xc4] ss:$16 sps:$4 sm:$0xff]  }
  0x3c   : > { %v1675_v26 = vld [vmem:[%s2031_s28 + $0xcc] ss:$16 sps:$4 sm:$0xff]   ;;  %v1677_v27 = vld [vmem:[%s2031_s28 + $0xc0] ss:$16 sps:$4 sm:$0xff]   ;;  %v1678_v28 = vld [vmem:[%s2031_s28 + $0xc8] ss:$16 sps:$4 sm:$0xff]  }
  0x3d   : > { %647 = vmatpush1.bf16.msra.mxu0 %v1653_v11  ;;  %688 = vmatpush1.bf16.msra.mxu1 %v1654_v12  ;;  %v1679_v29 = vld [vmem:[%s2031_s28 + $0xe4] ss:$16 sps:$4 sm:$0xff]   ;;  %v1681_v30 = vld [vmem:[%s2031_s28 + $0xec] ss:$16 sps:$4 sm:$0xff]   ;;  %s1357_s20 = sshll.u32 %s1905_s12, 1  ;;  %vm245_vm0 = vcmask 1043456  }
  0x3e   : > { %648 = vmatprep.subr.bf16.mxu0 %v1655_v13  ;;  %689 = vmatprep.subr.bf16.mxu1 %v1657_v14  ;;  %v1683_v31 = vld [vmem:[%s2031_s28 + $0xe0] ss:$16 sps:$4 sm:$0xff]   ;;  %v1684_v32 = vld [vmem:[%s2031_s28 + $0xe8] ss:$16 sps:$4 sm:$0xff]   ;;  %v1685_v33 = vld [vmem:[%s2031_s28 + $0x104] ss:$16 sps:$4 sm:$0xff]  }
  0x3f   : > { %p202_p7 = scmp.lt.s32.totalorder %s1357_s20, 3  ;;  %v1687_v34 = vld [vmem:[%s2031_s28 + $0x10c] ss:$16 sps:$4 sm:$0xff]   ;;  %v1689_v35 = vld [vmem:[%s2031_s28 + $0x100] ss:$16 sps:$4 sm:$0xff]   ;;  %vm246_vm1 = vcmask 556036  }
  0x40   : > { %v1690_v36 = vld [vmem:[%s2031_s28 + $0x108] ss:$16 sps:$4 sm:$0xff]   ;;  %v1691_v37 = vld [vmem:[%s2031_s28 + $0x124] ss:$16 sps:$4 sm:$0xff]   ;;  %v1693_v38 = vld [vmem:[%s2031_s28 + $0x12c] ss:$16 sps:$4 sm:$0xff]  }
  0x41   : > { %649 = vmatpush1.bf16.msra.mxu0 %v1659_v15  ;;  %690 = vmatpush1.bf16.msra.mxu1 %v1660_v16  ;;  %s2227_s20 = smov (!%p202_p7, %s1357_s20), 3  ;;  %v1695_v39 = vld [vmem:[%s2031_s28 + $0x120] ss:$16 sps:$4 sm:$0xff]   ;;  %v1696_v40 = vld [vmem:[%s2031_s28 + $0x128] ss:$16 sps:$4 sm:$0xff]   ;;  %vm2095_vm2 = vmor %vm246_vm1, %vm245_vm0 }
  0x42   : > { %650 = vmatprep.subr.bf16.mxu0 %v1661_v17  ;;  %691 = vmatprep.subr.bf16.mxu1 %v1663_v18  ;;  %v1697_v41 = vld [vmem:[%s2031_s28 + $0x144] ss:$16 sps:$4 sm:$0xff]   ;;  %s1571_s12 = sshll.u32 %s2227_s20, 4  ;;  %v1699_v42 = vld [vmem:[%s2031_s28 + $0x14c] ss:$16 sps:$4 sm:$0xff]  }
  0x43   : > { %v1701_v43 = vld [vmem:[%s2031_s28 + $0x140] ss:$16 sps:$4 sm:$0xff]   ;;  %v1702_v44 = vld [vmem:[%s2031_s28 + $0x148] ss:$16 sps:$4 sm:$0xff]   ;;  %s2090_s30 = scalar_lea.vmem %s2211_s0, %s1571_s12  ;;  %v1703_v45 = vld [vmem:[%s2031_s28 + $0x164] ss:$16 sps:$4 sm:$0xff]   ;;  %s219_s5 = scalar_lea.vmem %s2213_s2, %s1571_s12 }
  0x44   : > { %v1705_v46 = vld [vmem:[%s2031_s28 + $0x16c] ss:$16 sps:$4 sm:$0xff]   ;;  %v225_v47 = vld [vmem:[%s2090_s30] sm:$0xff]  ;;  %v1708_v51 = vld [vmem:[%s2031_s28 + $0x168] ss:$16 sps:$4 sm:$0xff]  }
  0x45   : > { %651 = vmatpush1.bf16.msra.mxu0 %v1665_v19  ;;  %692 = vmatpush1.bf16.msra.mxu1 %v1666_v20  ;;  %v226_v49 = vld [vmem:[%s2090_s30 + $0x8] sm:$0xff]  ;;  %v1707_v50 = vld [vmem:[%s2031_s28 + $0x160] ss:$16 sps:$4 sm:$0xff]   ;;  %v1709_v53 = vld [vmem:[%s2031_s28 + $0x184] ss:$16 sps:$4 sm:$0xff]  }
  0x46   : > { %652 = vmatprep.subr.bf16.mxu0 %v1667_v21  ;;  %693 = vmatprep.subr.bf16.mxu1 %v1669_v22  ;;  %v1573_v52 = vpack.c.bf16 %v226_v49, %v225_v47  ;;  %v1711_v54 = vld [vmem:[%s2031_s28 + $0x18c] ss:$16 sps:$4 sm:$0xff]   ;;  %v1713_v55 = vld [vmem:[%s2031_s28 + $0x180] ss:$16 sps:$4 sm:$0xff]   ;;  %v1714_v56 = vld [vmem:[%s2031_s28 + $0x188] ss:$16 sps:$4 sm:$0xff]  }
  0x47   : > { %v1715_v57 = vld [vmem:[%s2031_s28 + $0x1a4] ss:$16 sps:$4 sm:$0xff]   ;;  %v1717_v58 = vld [vmem:[%s2031_s28 + $0x1ac] ss:$16 sps:$4 sm:$0xff]   ;;  %v1719_v59 = vld [vmem:[%s2031_s28 + $0x1a0] ss:$16 sps:$4 sm:$0xff]  }
  0x48   : > { %248 = vst.msk [vmem:[#allocation2] sm:$0xff] %vm2095_vm2, %v1573_v52  ;;  %v1720_v60 = vld [vmem:[%s2031_s28 + $0x1a8] ss:$16 sps:$4 sm:$0xff]   ;;  %v1721_v61 = vld [vmem:[%s2031_s28 + $0x1c4] ss:$16 sps:$4 sm:$0xff]  }
  0x49   : > { %653 = vmatpush1.bf16.msra.mxu0 %v1671_v23  ;;  %694 = vmatpush1.bf16.msra.mxu1 %v1672_v24  ;;  %v1723_v62 = vld [vmem:[%s2031_s28 + $0x1cc] ss:$16 sps:$4 sm:$0xff]   ;;  %v1725_v1 = vld [vmem:[%s2031_s28 + $0x1c0] ss:$16 sps:$4 sm:$0xff]   ;;  %v1726_v2 = vld [vmem:[%s2031_s28 + $0x1c8] ss:$16 sps:$4 sm:$0xff]  }
  0x4a   : > { %654 = vmatprep.subr.bf16.mxu0 %v1673_v25  ;;  %695 = vmatprep.subr.bf16.mxu1 %v1675_v26  ;;  %v1727_v3 = vld [vmem:[%s2031_s28 + $0x1e4] ss:$16 sps:$4 sm:$0xff]   ;;  %v1729_v4 = vld [vmem:[%s2031_s28 + $0x1ec] ss:$16 sps:$4 sm:$0xff]   ;;  %v1731_v5 = vld [vmem:[%s2031_s28 + $0x1e0] ss:$16 sps:$4 sm:$0xff]  }
  0x4b   : > { %v1732_v6 = vld [vmem:[%s2031_s28 + $0x1e8] ss:$16 sps:$4 sm:$0xff]   ;;  %v1737_v7 = vld [vmem:[%s2031_s28 + $0x204] ss:$16 sps:$4 sm:$0xff]   ;;  %v1740_v8 = vld [vmem:[%s2031_s28 + $0x20c] ss:$16 sps:$4 sm:$0xff]  }
  0x4c   : > { %v1735_v10 = vld [vmem:[%s2031_s28 + $0x200] ss:$16 sps:$4 sm:$0xff]   ;;  %v1738_v11 = vld [vmem:[%s2031_s28 + $0x208] ss:$16 sps:$4 sm:$0xff]   ;;  %v1743_v12 = vld [vmem:[%s2031_s28 + $0x224] ss:$16 sps:$4 sm:$0xff]  }
  0x4d   : > { %655 = vmatpush1.bf16.msra.mxu0 %v1677_v27  ;;  %696 = vmatpush1.bf16.msra.mxu1 %v1678_v28  ;;  %v1746_v13 = vld [vmem:[%s2031_s28 + $0x22c] ss:$16 sps:$4 sm:$0xff]   ;;  %v1741_v14 = vld [vmem:[%s2031_s28 + $0x220] ss:$16 sps:$4 sm:$0xff]   ;;  %v1744_v15 = vld [vmem:[%s2031_s28 + $0x228] ss:$16 sps:$4 sm:$0xff]  }
  0x4e   : > { %656 = vmatprep.subr.bf16.mxu0 %v1679_v29  ;;  %697 = vmatprep.subr.bf16.mxu1 %v1681_v30  ;;  %v1749_v16 = vld [vmem:[%s2031_s28 + $0x244] ss:$16 sps:$4 sm:$0xff]   ;;  %v1752_v17 = vld [vmem:[%s2031_s28 + $0x24c] ss:$16 sps:$4 sm:$0xff]   ;;  %v1747_v18 = vld [vmem:[%s2031_s28 + $0x240] ss:$16 sps:$4 sm:$0xff]  }
  0x4f   : > { %v250_v63 = vld [vmem:[#allocation2] sm:$0xff]  ;;  %v1750_v19 = vld [vmem:[%s2031_s28 + $0x248] ss:$16 sps:$4 sm:$0xff]   ;;  %v1758_v21 = vld [vmem:[%s2031_s28 + $0x26c] ss:$16 sps:$4 sm:$0xff]  }
  0x50   : > { %v1366_v0 = vcombine.high %v250_v63, %v250_v63  ;;  %v1365_v9 = vcombine.low %v250_v63, %v250_v63  ;;  %v1755_v20 = vld [vmem:[%s2031_s28 + $0x264] ss:$16 sps:$4 sm:$0xff]   ;;  %v1753_v22 = vld [vmem:[%s2031_s28 + $0x260] ss:$16 sps:$4 sm:$0xff]   ;;  %v1756_v23 = vld [vmem:[%s2031_s28 + $0x268] ss:$16 sps:$4 sm:$0xff]  }
  0x51   : > { %657 = vmatpush1.bf16.msra.mxu0 %v1683_v31  ;;  %698 = vmatpush1.bf16.msra.mxu1 %v1684_v32  ;;  %v1761_v24 = vld [vmem:[%s2031_s28 + $0x284] ss:$16 sps:$4 sm:$0xff]   ;;  %v1764_v25 = vld [vmem:[%s2031_s28 + $0x28c] ss:$16 sps:$4 sm:$0xff]   ;;  %v1759_v26 = vld [vmem:[%s2031_s28 + $0x280] ss:$16 sps:$4 sm:$0xff]  }
  0x52   : > { %658 = vmatprep.subr.bf16.mxu0 %v1685_v33  ;;  %699 = vmatprep.subr.bf16.mxu1 %v1687_v34  ;;  %v1762_v27 = vld [vmem:[%s2031_s28 + $0x288] ss:$16 sps:$4 sm:$0xff]   ;;  %v1767_v28 = vld [vmem:[%s2031_s28 + $0x2a4] ss:$16 sps:$4 sm:$0xff]   ;;  %v1770_v29 = vld [vmem:[%s2031_s28 + $0x2ac] ss:$16 sps:$4 sm:$0xff]  }
  0x53   : > { %674 = vmatprep.mubr.bf16.mxu0 %v1366_v0  ;;  %715 = vmatprep.mubr.bf16.mxu1 %v1366_v0  ;;  %v1765_v30 = vld [vmem:[%s2031_s28 + $0x2a0] ss:$16 sps:$4 sm:$0xff]   ;;  %v1768_v31 = vld [vmem:[%s2031_s28 + $0x2a8] ss:$16 sps:$4 sm:$0xff]   ;;  %v1773_v32 = vld [vmem:[%s2031_s28 + $0x2c4] ss:$16 sps:$4 sm:$0xff]  }
  0x54   : > { %v1776_v33 = vld [vmem:[%s2031_s28 + $0x2cc] ss:$16 sps:$4 sm:$0xff]   ;;  %v227_v34 = vld [vmem:[%s2090_s30 + $0x10] sm:$0xff]  ;;  %v1792_v52 = vld [vmem:[%s2031_s28 + $0x328] ss:$16 sps:$4 sm:$0xff]  }
  0x55   : > { %659 = vmatpush1.bf16.msra.mxu0 %v1689_v35  ;;  %700 = vmatpush1.bf16.msra.mxu1 %v1690_v36  ;;  %v228_v35 = vld [vmem:[%s2090_s30 + $0x18] sm:$0xff]  ;;  %v1791_v48 = vld [vmem:[%s2031_s28 + $0x324] ss:$16 sps:$4 sm:$0xff]   ;;  %v1807_v63 = vld [vmem:[%s2031_s28 + $0x380] ss:$16 sps:$4 sm:$0xff]  }
  0x56   : > { %660 = vmatprep.subr.bf16.mxu0 %v1691_v37  ;;  %701 = vmatprep.subr.bf16.mxu1 %v1693_v38  ;;  %v1574_v36 = vpack.c.bf16 %v228_v35, %v227_v34  ;;  %v1771_v37 = vld [vmem:[%s2031_s28 + $0x2c0] ss:$16 sps:$4 sm:$0xff]   ;;  %v1774_v38 = vld [vmem:[%s2031_s28 + $0x2c8] ss:$16 sps:$4 sm:$0xff]   ;;  %v1794_v49 = vld [vmem:[%s2031_s28 + $0x32c] ss:$16 sps:$4 sm:$0xff]  }
  0x57   : > { %v1810_v0 = vld [vmem:[%s2031_s28 + $0x388] ss:$16 sps:$4 sm:$0xff]  }
  0x58   : > { %249 = vst.msk [vmem:[#allocation2 + $0x8] sm:$0xff] %vm2095_vm2, %v1574_v36 }
  0x59   : > { %661 = vmatpush1.bf16.msra.mxu0 %v1695_v39  ;;  %702 = vmatpush1.bf16.msra.mxu1 %v1696_v40  ;;  %v1779_v39 = vld [vmem:[%s2031_s28 + $0x2e4] ss:$16 sps:$4 sm:$0xff]   ;;  %v1782_v40 = vld [vmem:[%s2031_s28 + $0x2ec] ss:$16 sps:$4 sm:$0xff]  }
  0x5a   : > { %662 = vmatprep.subr.bf16.mxu0 %v1697_v41  ;;  %703 = vmatprep.subr.bf16.mxu1 %v1699_v42  ;;  %v1777_v41 = vld [vmem:[%s2031_s28 + $0x2e0] ss:$16 sps:$4 sm:$0xff]   ;;  %v1780_v42 = vld [vmem:[%s2031_s28 + $0x2e8] ss:$16 sps:$4 sm:$0xff]  }
  0x5d   : > { %663 = vmatpush1.bf16.msra.mxu0 %v1701_v43  ;;  %704 = vmatpush1.bf16.msra.mxu1 %v1702_v44  ;;  %v1785_v43 = vld [vmem:[%s2031_s28 + $0x304] ss:$16 sps:$4 sm:$0xff]   ;;  %v1788_v44 = vld [vmem:[%s2031_s28 + $0x30c] ss:$16 sps:$4 sm:$0xff]  }
  0x5e   : > { %664 = vmatprep.subr.bf16.mxu0 %v1703_v45  ;;  %705 = vmatprep.subr.bf16.mxu1 %v1705_v46  ;;  %v1783_v45 = vld [vmem:[%s2031_s28 + $0x300] ss:$16 sps:$4 sm:$0xff]   ;;  %v1786_v46 = vld [vmem:[%s2031_s28 + $0x308] ss:$16 sps:$4 sm:$0xff]  }
  0x5f   : > { %v743_v47 = vld [vmem:[#allocation2 + $0x8] sm:$0xff] }
  0x61   : > { %665 = vmatpush1.bf16.msra.mxu0 %v1707_v50  ;;  %706 = vmatpush1.bf16.msra.mxu1 %v1708_v51  ;;  %v1498_v50 = vcombine.high %v743_v47, %v743_v47  ;;  %v1789_v51 = vld [vmem:[%s2031_s28 + $0x320] ss:$16 sps:$4 sm:$0xff]  }
  0x62   : > { %666 = vmatprep.subr.bf16.mxu0 %v1709_v53  ;;  %707 = vmatprep.subr.bf16.mxu1 %v1711_v54  ;;  %v1797_v53 = vld [vmem:[%s2031_s28 + $0x344] ss:$16 sps:$4 sm:$0xff]   ;;  %v1800_v54 = vld [vmem:[%s2031_s28 + $0x34c] ss:$16 sps:$4 sm:$0xff]  }
  0x65   : > { %667 = vmatpush1.bf16.msra.mxu0 %v1713_v55  ;;  %708 = vmatpush1.bf16.msra.mxu1 %v1714_v56  ;;  %v1795_v55 = vld [vmem:[%s2031_s28 + $0x340] ss:$16 sps:$4 sm:$0xff]   ;;  %v1798_v56 = vld [vmem:[%s2031_s28 + $0x348] ss:$16 sps:$4 sm:$0xff]  }
  0x66   : > { %668 = vmatprep.subr.bf16.mxu0 %v1715_v57  ;;  %709 = vmatprep.subr.bf16.mxu1 %v1717_v58  ;;  %v1803_v57 = vld [vmem:[%s2031_s28 + $0x364] ss:$16 sps:$4 sm:$0xff]   ;;  %v1806_v58 = vld [vmem:[%s2031_s28 + $0x36c] ss:$16 sps:$4 sm:$0xff]  }
  0x69   : > { %669 = vmatpush1.bf16.msra.mxu0 %v1719_v59  ;;  %710 = vmatpush1.bf16.msra.mxu1 %v1720_v60  ;;  %v1801_v59 = vld [vmem:[%s2031_s28 + $0x360] ss:$16 sps:$4 sm:$0xff]   ;;  %v1804_v60 = vld [vmem:[%s2031_s28 + $0x368] ss:$16 sps:$4 sm:$0xff]  }
  0x6a   : > { %670 = vmatprep.subr.bf16.mxu0 %v1721_v61  ;;  %711 = vmatprep.subr.bf16.mxu1 %v1723_v62  ;;  %v1809_v61 = vld [vmem:[%s2031_s28 + $0x384] ss:$16 sps:$4 sm:$0xff]   ;;  %v1812_v62 = vld [vmem:[%s2031_s28 + $0x38c] ss:$16 sps:$4 sm:$0xff]  }
  0x6d   : > { %671 = vmatpush1.bf16.msra.mxu0 %v1725_v1  ;;  %712 = vmatpush1.bf16.msra.mxu1 %v1726_v2  ;;  %v1815_v1 = vld [vmem:[%s2031_s28 + $0x3a4] ss:$16 sps:$4 sm:$0xff]   ;;  %v1818_v2 = vld [vmem:[%s2031_s28 + $0x3ac] ss:$16 sps:$4 sm:$0xff]  }
  0x6e   : > { %672 = vmatprep.subr.bf16.mxu0 %v1727_v3  ;;  %713 = vmatprep.subr.bf16.mxu1 %v1729_v4  ;;  %v1813_v3 = vld [vmem:[%s2031_s28 + $0x3a0] ss:$16 sps:$4 sm:$0xff]   ;;  %v1816_v4 = vld [vmem:[%s2031_s28 + $0x3a8] ss:$16 sps:$4 sm:$0xff]  }
  0x71   : > { %673 = vmatpush1.bf16.msra.mxu0 %v1731_v5  ;;  %714 = vmatpush1.bf16.msra.mxu1 %v1732_v6  ;;  %v1821_v5 = vld [vmem:[%s2031_s28 + $0x3c4] ss:$16 sps:$4 sm:$0xff]   ;;  %v1824_v6 = vld [vmem:[%s2031_s28 + $0x3cc] ss:$16 sps:$4 sm:$0xff]  }
  0x72   : > { %1136 = vmatprep.subr.bf16.mxu0 %v1737_v7  ;;  %1177 = vmatprep.subr.bf16.mxu1 %v1740_v8  ;;  %v1819_v7 = vld [vmem:[%s2031_s28 + $0x3c0] ss:$16 sps:$4 sm:$0xff]   ;;  %v1822_v8 = vld [vmem:[%s2031_s28 + $0x3c8] ss:$16 sps:$4 sm:$0xff]  }
  0x74   : > { %675 = vmatmul.mubr.bf16.vlgmr.msra.gmra.mrb[0].mxu0 %v1365_v9  ;;  %716 = vmatmul.mubr.bf16.vlgmr.msra.gmra.mrb[0].mxu1 %v1365_v9  ;;  %v1827_v9 = vld [vmem:[%s2031_s28 + $0x3e4] ss:$16 sps:$4 sm:$0xff]  }
  0x75   : > { %1137 = vmatpush1.bf16.msra.mxu0 %v1735_v10  ;;  %1178 = vmatpush1.bf16.msra.mxu1 %v1738_v11  ;;  %v1830_v10 = vld [vmem:[%s2031_s28 + $0x3ec] ss:$16 sps:$4 sm:$0xff]   ;;  %v1825_v11 = vld [vmem:[%s2031_s28 + $0x3e0] ss:$16 sps:$4 sm:$0xff]  }
  0x76   : > { %1138 = vmatprep.subr.bf16.mxu0 %v1743_v12  ;;  %1179 = vmatprep.subr.bf16.mxu1 %v1746_v13  ;;  %v1828_v12 = vld [vmem:[%s2031_s28 + $0x3e8] ss:$16 sps:$4 sm:$0xff]   ;;  %v1497_v13 = vcombine.low %v743_v47, %v743_v47 }
  0x77   : > { %1168 = vmatprep.mubr.bf16.mxu0 %v1498_v50  ;;  %1209 = vmatprep.mubr.bf16.mxu1 %v1498_v50 }
  0x79   : > { %1139 = vmatpush1.bf16.msra.mxu0 %v1741_v14  ;;  %1180 = vmatpush1.bf16.msra.mxu1 %v1744_v15 }
  0x7a   : > { %1140 = vmatprep.subr.bf16.mxu0 %v1749_v16  ;;  %1181 = vmatprep.subr.bf16.mxu1 %v1752_v17 }
  0x7d   : > { %1141 = vmatpush1.bf16.msra.mxu0 %v1747_v18  ;;  %1182 = vmatpush1.bf16.msra.mxu1 %v1750_v19 }
  0x7e   : > { %1142 = vmatprep.subr.bf16.mxu0 %v1755_v20  ;;  %1183 = vmatprep.subr.bf16.mxu1 %v1758_v21 }
  0x81   : > { %1143 = vmatpush1.bf16.msra.mxu0 %v1753_v22  ;;  %1184 = vmatpush1.bf16.msra.mxu1 %v1756_v23 }
  0x82   : > { %1144 = vmatprep.subr.bf16.mxu0 %v1761_v24  ;;  %1185 = vmatprep.subr.bf16.mxu1 %v1764_v25 }
  0x85   : > { %1145 = vmatpush1.bf16.msra.mxu0 %v1759_v26  ;;  %1186 = vmatpush1.bf16.msra.mxu1 %v1762_v27 }
  0x86   : > { %1146 = vmatprep.subr.bf16.mxu0 %v1767_v28  ;;  %1187 = vmatprep.subr.bf16.mxu1 %v1770_v29 }
  0x89   : > { %1147 = vmatpush1.bf16.msra.mxu0 %v1765_v30  ;;  %1188 = vmatpush1.bf16.msra.mxu1 %v1768_v31 }
  0x8a   : > { %1148 = vmatprep.subr.bf16.mxu0 %v1773_v32  ;;  %1189 = vmatprep.subr.bf16.mxu1 %v1776_v33 }
  0x8d   : > { %1149 = vmatpush1.bf16.msra.mxu0 %v1771_v37  ;;  %1190 = vmatpush1.bf16.msra.mxu1 %v1774_v38 }
  0x8e   : > { %1150 = vmatprep.subr.bf16.mxu0 %v1779_v39  ;;  %1191 = vmatprep.subr.bf16.mxu1 %v1782_v40 }
  0x91   : > { %1151 = vmatpush1.bf16.msra.mxu0 %v1777_v41  ;;  %1192 = vmatpush1.bf16.msra.mxu1 %v1780_v42 }
  0x92   : > { %1152 = vmatprep.subr.bf16.mxu0 %v1785_v43  ;;  %1193 = vmatprep.subr.bf16.mxu1 %v1788_v44 }
  0x95   : > { %1153 = vmatpush1.bf16.msra.mxu0 %v1783_v45  ;;  %1194 = vmatpush1.bf16.msra.mxu1 %v1786_v46 }
  0x96   : > { %1154 = vmatprep.subr.bf16.mxu0 %v1791_v48  ;;  %1195 = vmatprep.subr.bf16.mxu1 %v1794_v49 }
  0x99   : > { %1155 = vmatpush1.bf16.msra.mxu0 %v1789_v51  ;;  %1196 = vmatpush1.bf16.msra.mxu1 %v1792_v52 }
  0x9a   : > { %1156 = vmatprep.subr.bf16.mxu0 %v1797_v53  ;;  %1197 = vmatprep.subr.bf16.mxu1 %v1800_v54 }
  0x9d   : > { %1157 = vmatpush1.bf16.msra.mxu0 %v1795_v55  ;;  %1198 = vmatpush1.bf16.msra.mxu1 %v1798_v56 }
  0x9e   : > { %1158 = vmatprep.subr.bf16.mxu0 %v1803_v57  ;;  %1199 = vmatprep.subr.bf16.mxu1 %v1806_v58 }
  0xa1   : > { %1159 = vmatpush1.bf16.msra.mxu0 %v1801_v59  ;;  %1200 = vmatpush1.bf16.msra.mxu1 %v1804_v60 }
  0xa2   : > { %1160 = vmatprep.subr.bf16.mxu0 %v1809_v61  ;;  %1201 = vmatprep.subr.bf16.mxu1 %v1812_v62 }
  0xa5   : > { %1161 = vmatpush1.bf16.msra.mxu0 %v1807_v63  ;;  %1202 = vmatpush1.bf16.msra.mxu1 %v1810_v0 }
  0xa6   : > { %1162 = vmatprep.subr.bf16.mxu0 %v1815_v1  ;;  %1203 = vmatprep.subr.bf16.mxu1 %v1818_v2 }
  0xa9   : > { %1163 = vmatpush1.bf16.msra.mxu0 %v1813_v3  ;;  %1204 = vmatpush1.bf16.msra.mxu1 %v1816_v4 }
  0xaa   : > { %1164 = vmatprep.subr.bf16.mxu0 %v1821_v5  ;;  %1205 = vmatprep.subr.bf16.mxu1 %v1824_v6 }
  0xad   : > { %1165 = vmatpush1.bf16.msra.mxu0 %v1819_v7  ;;  %1206 = vmatpush1.bf16.msra.mxu1 %v1822_v8 }
  0xae   : > { %1166 = vmatprep.subr.bf16.mxu0 %v1827_v9  ;;  %1207 = vmatprep.subr.bf16.mxu1 %v1830_v10 }
  0xb1   : > { %1167 = vmatpush1.bf16.msra.mxu0 %v1825_v11  ;;  %1208 = vmatpush1.bf16.msra.mxu1 %v1828_v12 }
  0xb4   : > { %1169 = vmatmul.mubr.bf16.vlgmr.msra.gmra.mrb[4].mxu0 %v1497_v13  ;;  %1210 = vmatmul.mubr.bf16.vlgmr.msra.gmra.mrb[4].mxu1 %v1497_v13 }
 0x147   : > { %v676_v14 = vpop.f32.mrb[0].mxu0  ;;  %v717_v15 = vpop.f32.mrb[0].mxu1 }
 0x148   : > { %v678_v16 = vpop.f32.mrb[1].mxu0  ;;  %v719_v17 = vpop.f32.mrb[1].mxu1 }
 0x149   : > { %v1575_v18 = vpack.c.bf16 %v678_v16, %v676_v14  ;;  %v1576_v19 = vpack.c.bf16 %v719_v17, %v717_v15  ;;  %v680_v20 = vpop.f32.mrb[2].mxu0  ;;  %v721_v21 = vpop.f32.mrb[2].mxu1 }
 0x14a   : > { %v681_v22 = vpop.f32.mrb[3].mxu0  ;;  %v722_v23 = vpop.f32.mrb[3].mxu1 }
 0x14b   : > { %740 = vst [vmem:[%s219_s5] sm:$0xff] %v1575_v18  ;;  %741 = vst [vmem:[%s219_s5 + $0x8] sm:$0xff] %v1576_v19 }
 0x187   : > { %v1170_v24 = vpop.f32.mrb[4].mxu0  ;;  %v1211_v25 = vpop.f32.mrb[4].mxu1 }
 0x188   : > { %v1172_v26 = vpop.f32.mrb[5].mxu0  ;;  %v1213_v27 = vpop.f32.mrb[5].mxu1 }
 0x189   : > { %v1577_v28 = vpack.c.bf16 %v1172_v26, %v1170_v24  ;;  %v1578_v29 = vpack.c.bf16 %v1213_v27, %v1211_v25  ;;  %v1174_v30 = vpop.f32.mrb[6].mxu0  ;;  %v1215_v31 = vpop.f32.mrb[6].mxu1 }
 0x18a   : > { %v1175_v32 = vpop.f32.mrb[7].mxu0  ;;  %v1216_v33 = vpop.f32.mrb[7].mxu1 }
 0x18b   : > { %1565 = vst [vmem:[%s219_s5 + $0x10] sm:$0xff] %v1577_v28  ;;  %1566 = vst [vmem:[%s219_s5 + $0x18] sm:$0xff] %v1578_v29 }
 0x18c PF: > { %s15_s14 = sadd.s32 1, %s1913_s14   ;;  %s2219_s9 = smov %s1897_s10 }
 0x18d   : > { %p12_p9 = scmp.ge.s32.totalorder %s15_s14, 4   ;;  %s2220_s10 = smov %s1901_s11 }
 0x18e   : > { %s2221_s11 = smov %s1983_s21  ;;  %s2222_s12 = smov %s1909_s13 }
 0x18f   : > { %s2223_s13 = smov %s2225_s16  ;;  %14 = sbr.rel (!%p12_p9) target bundleno = 4 (0x4), region = 74 }
 0x196   :  { %1270 = vsyncpa [#allocation4], 1 }
 0x197   :  { %1272 = vsyncpa [#allocation4 + $0x1], 1 }

</bundles_post_ra>
